<compile_context>
chip_gen: v7x
topology: tpu7x:2x2x1
jax: 0.10.0
libtpu: 0.0.40
codegen_flags: <defaults>
</compile_context>

<pallas_src>
import jax
import jax.numpy as jnp
from jax.experimental import pallas as pl
from jax.experimental.pallas import tpu as pltpu

IN_FEATURES = 1 * 28 * 28     # 784
HIDDEN = 20
OUT_FEATURES = 10
N_PAD = 128                   # lane-padded width used only inside the kernel
NEG_BIG = -1e30               # "-inf" for padded logits (finite, exp() == 0, no NaN)


def mlp_kernel(x_ref, w1_ref, b1_ref, w2_ref, b2_ref, o_ref):
    # x_ref:  (TB, 784) f32     w1_ref: (784, 20) bf16   b1_ref: (1, 20) f32
    # w2_ref: (20, 128) bf16    b2_ref: (1, 128) f32     o_ref:  (TB, 10) f32
    # Cast to bf16 in-kernel (VPU pack hides under the x DMA shadow).
    x = x_ref[...].astype(jnp.bfloat16)

    # Layer 1 (MXU bf16 x bf16, f32 accumulate) + tanh in f32.
    h = jnp.dot(x, w1_ref[...], preferred_element_type=jnp.float32) + b1_ref[...]
    h = jnp.tanh(h)

    # Layer 2 into a 128-lane padded tile. Padded columns: zero weights + NEG_BIG bias
    # -> behave like -inf logits and never affect max / sum below.
    z = jnp.dot(h.astype(jnp.bfloat16), w2_ref[...],
                preferred_element_type=jnp.float32) + b2_ref[...]

    # Numerically stable LogSoftmax over the (padded) feature axis.
    m = jnp.max(z, axis=-1, keepdims=True)
    zs = z - m
    lse = jnp.log(jnp.sum(jnp.exp(zs), axis=-1, keepdims=True))
    logp = zs - lse

    # Store only the 10 real classes (output array is exactly (B, 10)).
    o_ref[...] = logp[:, :o_ref.shape[-1]].astype(o_ref.dtype)


def _round_up(n, m):
    return ((n + m - 1) // m) * m


def mlp_forward(x_nchw, w1, b1, w2, b2, *, tb=4096):
    """x_nchw: (B, 1, 28, 28). w1: (20, 784), b1: (20,), w2: (10, 20), b2: (10,).
    Returns (B, 10) f32 log-probabilities (matches the PyTorch module)."""
    # torch: x.view(-1, 784). Free metadata reshape; keep the original dtype
    # (no standalone bf16 copy of x in HBM).
    x = x_nchw.reshape(-1, IN_FEATURES)
    B = x.shape[0]

    w1_t = w1.T.astype(jnp.bfloat16)                       # (784, 20)
    b1_2d = b1.reshape(1, HIDDEN).astype(jnp.float32)      # (1, 20)

    # Layer-2 weights padded to 128 lanes (bf16), padded bias = NEG_BIG.
    w2_t = (jnp.zeros((HIDDEN, N_PAD), jnp.bfloat16)
            .at[:, :OUT_FEATURES].set(w2.T.astype(jnp.bfloat16)))
    b2_p = (jnp.full((1, N_PAD), NEG_BIG, jnp.float32)
            .at[:, :OUT_FEATURES].set(b2.astype(jnp.float32)))

    # Batch tile: multiple of 8 (f32 sublane packing); ragged tail handled by Pallas.
    TB = min(tb, _round_up(B, 8))
    grid = (pl.cdiv(B, TB),)

    out = pl.pallas_call(
        mlp_kernel,
        out_shape=jax.ShapeDtypeStruct((B, OUT_FEATURES), jnp.float32),
        grid=grid,
        in_specs=[
            # x streams per grid step (double-buffered by Pallas).
            pl.BlockSpec((TB, IN_FEATURES), lambda i: (i, 0)),
            # Weights / biases: constant block index -> resident in VMEM, no re-DMA.
            pl.BlockSpec((IN_FEATURES, HIDDEN), lambda i: (0, 0)),
            pl.BlockSpec((1, HIDDEN), lambda i: (0, 0)),
            pl.BlockSpec((HIDDEN, N_PAD), lambda i: (0, 0)),
            pl.BlockSpec((1, N_PAD), lambda i: (0, 0)),
        ],
        out_specs=pl.BlockSpec((TB, OUT_FEATURES), lambda i: (i, 0)),
        compiler_params=pltpu.CompilerParams(
            dimension_semantics=("parallel",),   # lets v7x shard batch tiles over 2 TCs
            vmem_limit_bytes=40 << 20,           # covers TB=4096 f32 x double-buffered
        ),
    )(x, w1_t, b1_2d, w2_t, b2_p)

    return out


def init_params(key):
    """PyTorch-style default Linear init: U[-1/sqrt(fan_in), +1/sqrt(fan_in)]."""
    k1, k2, k3, k4 = jax.random.split(key, 4)
    bound1 = 1.0 / jnp.sqrt(float(IN_FEATURES))
    bound2 = 1.0 / jnp.sqrt(float(HIDDEN))
    w1 = jax.random.uniform(k1, (HIDDEN, IN_FEATURES), jnp.float32, -bound1, bound1)
    b1 = jax.random.uniform(k2, (HIDDEN,), jnp.float32, -bound1, bound1)
    w2 = jax.random.uniform(k3, (OUT_FEATURES, HIDDEN), jnp.float32, -bound2, bound2)
    b2 = jax.random.uniform(k4, (OUT_FEATURES,), jnp.float32, -bound2, bound2)
    return w1, b1, w2, b2


def reference_forward_f32(x_nchw, w1, b1, w2, b2):
    """Pure-f32 JAX reference (exact PyTorch semantics)."""
    x = x_nchw.reshape(x_nchw.shape[0], -1)
    h = jnp.tanh(x @ w1.T + b1)
    z = h @ w2.T + b2
    return jax.nn.log_softmax(z, axis=-1)


def reference_forward_bf16(x_nchw, w1, b1, w2, b2):
    """Reference matching the kernel's bf16-input / bf16-h matmuls with f32 accumulate."""
    x = x_nchw.reshape(x_nchw.shape[0], -1).astype(jnp.bfloat16)
    h = jnp.tanh(jnp.dot(x, w1.T.astype(jnp.bfloat16),
                         preferred_element_type=jnp.float32) + b1)
    z = jnp.dot(h.astype(jnp.bfloat16), w2.T.astype(jnp.bfloat16),
                preferred_element_type=jnp.float32) + b2
    return jax.nn.log_softmax(z, axis=-1)


if __name__ == "__main__":
    key = jax.random.PRNGKey(0)
    kx, kp = jax.random.split(key)
    x = jax.random.normal(kx, (8, 1, 28, 28), jnp.float32)  # small MNIST-shaped batch
    w1, b1, w2, b2 = init_params(kp)

    out = mlp_forward(x, w1, b1, w2, b2)
    out = jax.block_until_ready(out)
    assert out.shape == (8, 10), out.shape

    # Tight check vs a reference that mirrors the kernel's bf16 matmul inputs.
    ref_bf16 = reference_forward_bf16(x, w1, b1, w2, b2)
    assert jnp.allclose(out, ref_bf16, atol=1e-3, rtol=1e-3), "mismatch vs bf16 reference"

    # Looser check vs the exact f32 PyTorch semantics (bf16 quantization of x / h only).
    ref_f32 = reference_forward_f32(x, w1, b1, w2, b2)
    assert jnp.allclose(out, ref_f32, atol=3e-2, rtol=3e-2), "mismatch vs f32 reference"

    print("KERNEL_OK")
</pallas_src>

<mosaic_0001>
module attributes {stable_mosaic.version = 11 : i64} {
  func.func @mlp_kernel(%arg0: i32, %arg1: memref<8x784xf32, #tpu.memory_space<vmem>>, %arg2: memref<784x20xbf16, #tpu.memory_space<vmem>>, %arg3: memref<1x20xf32, #tpu.memory_space<vmem>>, %arg4: memref<20x128xbf16, #tpu.memory_space<vmem>>, %arg5: memref<1x128xf32, #tpu.memory_space<vmem>>, %arg6: memref<8x10xf32, #tpu.memory_space<vmem>>) attributes {dimension_semantics = [#tpu.dimension_semantics<parallel>], iteration_bounds = array<i64: 1>, scalar_prefetch = 0 : i64, scratch_operands = 0 : i64, tpu.core_type = #tpu.core_type<tc>, window_params = [{transform_indices = @transform_0, window_bounds = array<i64: 8, 784>}, {pipeline_mode = #tpu.pipeline_mode<synchronous>, transform_indices = @transform_1, window_bounds = array<i64: 784, 20>}, {pipeline_mode = #tpu.pipeline_mode<synchronous>, transform_indices = @transform_2, window_bounds = array<i64: 1, 20>}, {pipeline_mode = #tpu.pipeline_mode<synchronous>, transform_indices = @transform_3, window_bounds = array<i64: 20, 128>}, {pipeline_mode = #tpu.pipeline_mode<synchronous>, transform_indices = @transform_4, window_bounds = array<i64: 1, 128>}, {transform_indices = @transform_5, window_bounds = array<i64: 8, 10>}]} {
    %c0 = arith.constant 0 : index
    %c0_0 = arith.constant 0 : index
    %0 = vector.load %arg1[%c0, %c0_0] : memref<8x784xf32, #tpu.memory_space<vmem>>, vector<8x784xf32>
    %1 = arith.truncf %0 : vector<8x784xf32> to vector<8x784xbf16>
    %c0_1 = arith.constant 0 : index
    %c0_2 = arith.constant 0 : index
    %2 = vector.load %arg2[%c0_1, %c0_2] : memref<784x20xbf16, #tpu.memory_space<vmem>>, vector<784x20xbf16>
    %cst = arith.constant dense<0.000000e+00> : vector<8x20xf32>
    %3 = tpu.matmul %1, %2, %cst {dimension_numbers = #tpu.dot_dimension_numbers<[1], [0], [0], [1], [0, 0, 1, 1], [], []>} : vector<8x784xbf16>, vector<784x20xbf16>, vector<8x20xf32> -> vector<8x20xf32>
    %c0_3 = arith.constant 0 : index
    %c0_4 = arith.constant 0 : index
    %4 = vector.load %arg3[%c0_3, %c0_4] : memref<1x20xf32, #tpu.memory_space<vmem>>, vector<1x20xf32>
    %5 = vector.broadcast %4 : vector<1x20xf32> to vector<8x20xf32>
    %6 = arith.addf %3, %5 : vector<8x20xf32>
    %7 = math.tanh %6 : vector<8x20xf32>
    %8 = arith.truncf %7 : vector<8x20xf32> to vector<8x20xbf16>
    %c0_5 = arith.constant 0 : index
    %c0_6 = arith.constant 0 : index
    %9 = vector.load %arg4[%c0_5, %c0_6] : memref<20x128xbf16, #tpu.memory_space<vmem>>, vector<20x128xbf16>
    %cst_7 = arith.constant dense<0.000000e+00> : vector<8x128xf32>
    %10 = tpu.matmul %8, %9, %cst_7 {dimension_numbers = #tpu.dot_dimension_numbers<[1], [0], [0], [1], [0, 0, 1, 1], [], []>} : vector<8x20xbf16>, vector<20x128xbf16>, vector<8x128xf32> -> vector<8x128xf32>
    %c0_8 = arith.constant 0 : index
    %c0_9 = arith.constant 0 : index
    %11 = vector.load %arg5[%c0_8, %c0_9] : memref<1x128xf32, #tpu.memory_space<vmem>>, vector<1x128xf32>
    %12 = vector.broadcast %11 : vector<1x128xf32> to vector<8x128xf32>
    %13 = arith.addf %10, %12 : vector<8x128xf32>
    %cst_10 = arith.constant dense<0xFF800000> : vector<8xf32>
    %14 = vector.multi_reduction <maximumf>, %13, %cst_10 [1] : vector<8x128xf32> to vector<8xf32>
    %15 = vector.shape_cast %14 : vector<8xf32> to vector<8x1xf32>
    %16 = vector.broadcast %15 : vector<8x1xf32> to vector<8x128xf32>
    %17 = arith.subf %13, %16 : vector<8x128xf32>
    %18 = math.exp %17 : vector<8x128xf32>
    %cst_11 = arith.constant dense<0.000000e+00> : vector<8xf32>
    %19 = vector.multi_reduction <add>, %18, %cst_11 [1] : vector<8x128xf32> to vector<8xf32>
    %20 = vector.shape_cast %19 : vector<8xf32> to vector<8x1xf32>
    %21 = math.log %20 : vector<8x1xf32>
    %22 = vector.broadcast %21 : vector<8x1xf32> to vector<8x128xf32>
    %23 = arith.subf %17, %22 : vector<8x128xf32>
    %24 = vector.extract_strided_slice %23 {offsets = [0, 0], sizes = [8, 10], strides = [1, 1]} : vector<8x128xf32> to vector<8x10xf32>
    %c0_12 = arith.constant 0 : index
    %c0_13 = arith.constant 0 : index
    %25 = vector.load %arg6[%c0_12, %c0_13] : memref<8x10xf32, #tpu.memory_space<vmem>>, vector<8x10xf32>
    tpu.vector_store %arg6[%c0_12, %c0_13], %24 {strides = array<i32>} : memref<8x10xf32, #tpu.memory_space<vmem>>, vector<8x10xf32>,
    return
  }
  func.func @transform_0(%arg0: i32) -> (i32, i32) {
    %c0_i32 = arith.constant 0 : i32
    %c0_i32_0 = arith.constant 0 : i32
    return %arg0, %c0_i32 : i32, i32
  }
  func.func @transform_1(%arg0: i32) -> (i32, i32) {
    %c0_i32 = arith.constant 0 : i32
    %c0_i32_0 = arith.constant 0 : i32
    %c0_i32_1 = arith.constant 0 : i32
    return %c0_i32, %c0_i32_0 : i32, i32
  }
  func.func @transform_2(%arg0: i32) -> (i32, i32) {
    %c0_i32 = arith.constant 0 : i32
    %c0_i32_0 = arith.constant 0 : i32
    %c0_i32_1 = arith.constant 0 : i32
    return %c0_i32, %c0_i32_0 : i32, i32
  }
  func.func @transform_3(%arg0: i32) -> (i32, i32) {
    %c0_i32 = arith.constant 0 : i32
    %c0_i32_0 = arith.constant 0 : i32
    %c0_i32_1 = arith.constant 0 : i32
    return %c0_i32, %c0_i32_0 : i32, i32
  }
  func.func @transform_4(%arg0: i32) -> (i32, i32) {
    %c0_i32 = arith.constant 0 : i32
    %c0_i32_0 = arith.constant 0 : i32
    %c0_i32_1 = arith.constant 0 : i32
    return %c0_i32, %c0_i32_0 : i32, i32
  }
  func.func @transform_5(%arg0: i32) -> (i32, i32) {
    %c0_i32 = arith.constant 0 : i32
    %c0_i32_0 = arith.constant 0 : i32
    return %arg0, %c0_i32 : i32, i32
  }
}

</mosaic_0001>

<bundles_post_ra>
// kernel: tpu_custom_call.1
= control target key start
LH: loop header
LB: loop body
LE: loop exit
PB: predicated region body
PF: predicated region fallthrough
CT: control target
= control target key end

     0   :  { %v918_v44 = vmov 0.0   ;;  %vm919_vm0 = vmmov 0   ;;  %vm435_vm1 = vcmask 130048   ;;  %s1145_s0 = inlined_call_operand.vmem [shape: f32[8,784], index: 0, kind: input, shape index: {}]   ;;  %s1146_s1 = inlined_call_operand.vmem [shape: bf16[784,20], index: 1, kind: input, shape index: {}]   ;;  %s1147_s2 = inlined_call_operand.vmem [shape: f32[1,20], index: 2, kind: input, shape index: {}]   ;;  %s1148_s3 = inlined_call_operand.vmem [shape: bf16[20,128], index: 3, kind: input, shape index: {}]   ;;  %s1149_s4 = inlined_call_operand.vmem [shape: f32[1,128], index: 4, kind: input, shape index: {}]   ;;  %s1150_s5 = inlined_call_operand.hbm [shape: f32[8,10], index: 5, kind: output, shape index: {}]  }
   0x1   :  { %v837_v0 = vld [vmem:[%s1146_s1 + $0x40] sm:$0xff]   ;;  %v841_v4 = vld [vmem:[%s1146_s1 + $0x48] sm:$0xff]   ;;  %v845_v8 = vld [vmem:[%s1146_s1 + $0x50] sm:$0xff]  }
   0x2   :  { %v838_v1 = vld [vmem:[%s1146_s1] sm:$0xff]   ;;  %749 = vmatprep.subr.bf16.mxu0 %v837_v0  ;;  %v842_v5 = vld [vmem:[%s1146_s1 + $0x8] sm:$0xff]   ;;  %v846_v9 = vld [vmem:[%s1146_s1 + $0x10] sm:$0xff]  }
   0x3   :  { %v839_v2 = vld [vmem:[%s1146_s1 + $0xc0] sm:$0xff]   ;;  %750 = vmatpush3.bf16.msra.mxu0 %v838_v1  ;;  %v843_v6 = vld [vmem:[%s1146_s1 + $0xc8] sm:$0xff]   ;;  %v847_v10 = vld [vmem:[%s1146_s1 + $0xd0] sm:$0xff]  }
   0x4   :  { %v840_v3 = vld [vmem:[%s1146_s1 + $0x80] sm:$0xff]   ;;  %771 = vmatprep.subr.bf16.mxu1 %v839_v2  ;;  %751 = vmatprep.subr.bf16.mxu0 %v841_v4  ;;  %v844_v7 = vld [vmem:[%s1146_s1 + $0x88] sm:$0xff]   ;;  %v848_v11 = vld [vmem:[%s1146_s1 + $0x90] sm:$0xff]  }
   0x5   :  { %772 = vmatpush3.bf16.msra.mxu1 %v840_v3  ;;  %v849_v12 = vld [vmem:[%s1146_s1 + $0x58] sm:$0xff]   ;;  %v853_v16 = vld [vmem:[%s1146_s1 + $0x60] sm:$0xff]   ;;  %v857_v20 = vld [vmem:[%s1146_s1 + $0x68] sm:$0xff]  }
   0x6   :  { %773 = vmatprep.subr.bf16.mxu1 %v843_v6  ;;  %v850_v13 = vld [vmem:[%s1146_s1 + $0x18] sm:$0xff]   ;;  %v854_v17 = vld [vmem:[%s1146_s1 + $0x20] sm:$0xff]   ;;  %v858_v21 = vld [vmem:[%s1146_s1 + $0x28] sm:$0xff]  }
   0x7   :  { %752 = vmatpush3.bf16.msra.mxu0 %v842_v5  ;;  %v851_v14 = vld [vmem:[%s1146_s1 + $0xd8] sm:$0xff]   ;;  %v855_v18 = vld [vmem:[%s1146_s1 + $0xe0] sm:$0xff]   ;;  %v859_v22 = vld [vmem:[%s1146_s1 + $0xe8] sm:$0xff]  }
   0x8   :  { %753 = vmatprep.subr.bf16.mxu0 %v845_v8  ;;  %v852_v15 = vld [vmem:[%s1146_s1 + $0x98] sm:$0xff]   ;;  %v856_v19 = vld [vmem:[%s1146_s1 + $0xa0] sm:$0xff]   ;;  %v860_v23 = vld [vmem:[%s1146_s1 + $0xa8] sm:$0xff]  }
   0x9   :  { %774 = vmatpush3.bf16.msra.mxu1 %v844_v7  ;;  %v861_v24 = vld [vmem:[%s1146_s1 + $0x70] sm:$0xff]   ;;  %v865_v28 = vld [vmem:[%s1146_s1 + $0x78] sm:$0xff]   ;;  %v23_v31 = vld [vmem:[%s1145_s0 + $0x8] sm:$0xff] }
   0xa   :  { %775 = vmatprep.subr.bf16.mxu1 %v847_v10  ;;  %v862_v25 = vld [vmem:[%s1146_s1 + $0x30] sm:$0xff]   ;;  %v866_v29 = vld [vmem:[%s1146_s1 + $0x38] sm:$0xff]   ;;  %v30_v32 = vpack.c.bf16 %v23_v31, %v23_v31  ;;  %v22_v34 = vld [vmem:[%s1145_s0] sm:$0xff] }
   0xb   :  { %754 = vmatpush3.bf16.msra.mxu0 %v846_v9  ;;  %v863_v26 = vld [vmem:[%s1146_s1 + $0xf0] sm:$0xff]   ;;  %v867_v30 = vld [vmem:[%s1146_s1 + $0xf8] sm:$0xff]   ;;  %v29_v35 = vpack.c.bf16 %v22_v34, %v22_v34  ;;  %v869_v36 = vld [vmem:[%s1146_s1 + $0x140] sm:$0xff]  }
   0xc   :  { %755 = vmatprep.subr.bf16.mxu0 %v849_v12  ;;  %v864_v27 = vld [vmem:[%s1146_s1 + $0xb0] sm:$0xff]   ;;  %v868_v33 = vld [vmem:[%s1146_s1 + $0xb8] sm:$0xff]   ;;  %471 = vmatprep.mubr.bf16.mxu0 %v30_v32  ;;  %v870_v39 = vld [vmem:[%s1146_s1 + $0x100] sm:$0xff]  }
   0xd   :  { %776 = vmatpush3.bf16.msra.mxu1 %v848_v11  ;;  %v25_v37 = vld [vmem:[%s1145_s0 + $0x18] sm:$0xff]  ;;  %v24_v40 = vld [vmem:[%s1145_s0 + $0x10] sm:$0xff]  ;;  %v871_v42 = vld [vmem:[%s1146_s1 + $0x148] sm:$0xff]  }
   0xe   :  { %777 = vmatprep.subr.bf16.mxu1 %v851_v14  ;;  %v32_v38 = vpack.c.bf16 %v25_v37, %v25_v37  ;;  %v31_v41 = vpack.c.bf16 %v24_v40, %v24_v40  ;;  %v872_v43 = vld [vmem:[%s1146_s1 + $0x108] sm:$0xff]   ;;  %v873_v45 = vld [vmem:[%s1146_s1 + $0x150] sm:$0xff]   ;;  %v875_v47 = vld [vmem:[%s1146_s1 + $0x158] sm:$0xff]  }
   0xf   :  { %756 = vmatpush3.bf16.msra.mxu0 %v850_v13  ;;  %v874_v46 = vld [vmem:[%s1146_s1 + $0x110] sm:$0xff]   ;;  %v876_v48 = vld [vmem:[%s1146_s1 + $0x118] sm:$0xff]   ;;  %v877_v49 = vld [vmem:[%s1146_s1 + $0x160] sm:$0xff]  }
  0x10   :  { %757 = vmatprep.subr.bf16.mxu0 %v853_v16  ;;  %511 = vmatprep.mubr.bf16.mxu1 %v32_v38  ;;  %v878_v50 = vld [vmem:[%s1146_s1 + $0x120] sm:$0xff]   ;;  %v879_v51 = vld [vmem:[%s1146_s1 + $0x168] sm:$0xff]   ;;  %v28_v55 = vld [vmem:[%s1145_s0 + $0x30] sm:$0xff] }
  0x11   :  { %778 = vmatpush3.bf16.msra.mxu1 %v852_v15  ;;  %v885_v52 = vld [vmem:[%s1146_s1 + $0x180] sm:$0xff]   ;;  %v27_v53 = vld [vmem:[%s1145_s0 + $0x28] sm:$0xff]  ;;  %v35_v57 = vpack.c.bf16 %v28_v55, %v28_v55 }
  0x12   :  { %779 = vmatprep.subr.bf16.mxu1 %v855_v18  ;;  %v34_v54 = vpack.c.bf16 %v27_v53, %v27_v53  ;;  %v880_v56 = vld [vmem:[%s1146_s1 + $0x128] sm:$0xff]  }
  0x13   :  { %758 = vmatpush3.bf16.msra.mxu0 %v854_v17 }
  0x14   :  { %759 = vmatprep.subr.bf16.mxu0 %v857_v20 }
  0x15   :  { %780 = vmatpush3.bf16.msra.mxu1 %v856_v19 }
  0x16   :  { %781 = vmatprep.subr.bf16.mxu1 %v859_v22 }
  0x17   :  { %760 = vmatpush3.bf16.msra.mxu0 %v858_v21 }
  0x18   :  { %761 = vmatprep.subr.bf16.mxu0 %v861_v24 }
  0x19   :  { %782 = vmatpush3.bf16.msra.mxu1 %v860_v23 }
  0x1a   :  { %783 = vmatprep.subr.bf16.mxu1 %v863_v26 }
  0x1b   :  { %762 = vmatpush3.bf16.msra.mxu0 %v862_v25 }
  0x1c   :  { %763 = vmatprep.subr.bf16.mxu0 %v865_v28 }
  0x1d   :  { %784 = vmatpush3.bf16.msra.mxu1 %v864_v27 }
  0x1e   :  { %785 = vmatprep.subr.bf16.mxu1 %v867_v30 }
  0x1f   :  { %764 = vmatpush3.bf16.msra.mxu0 %v866_v29 }
  0x20   :  { %793 = vmatprep.subr.bf16.mxu0 %v869_v36 }
  0x21   :  { %786 = vmatpush3.bf16.msra.mxu1 %v868_v33 }
  0x22   :  { %472 = vmatmul.mubr.bf16.vlgmr.msra.gmra.mrb[0].mxu0 %v29_v35  ;;  %820 = vmatprep.subr.bf16.mxu1 %v918_v44 }
  0x23   :  { %794 = vmatpush3.bf16.msra.mxu0 %v870_v39 }
  0x24   :  { %512 = vmatmul.mubr.bf16.vlgmr.msra.gmra.mrb[0].mxu1 %v31_v41  ;;  %795 = vmatprep.subr.bf16.mxu0 %v871_v42 }
  0x25   :  { %822 = vmatprep.mubr.msk.bf16.mxu1 %vm919_vm0, %v918_v44  ;;  %821 = vmatpush3.bf16.msra.mxu1 %v885_v52 }
  0x27   :  { %796 = vmatpush3.bf16.msra.mxu0 %v872_v43 }
  0x28   :  { %797 = vmatprep.subr.bf16.mxu0 %v873_v45 }
  0x2b   :  { %798 = vmatpush3.bf16.msra.mxu0 %v874_v46 }
  0x2c   :  { %799 = vmatprep.subr.bf16.mxu0 %v875_v47 }
  0x2f   :  { %800 = vmatpush3.bf16.msra.mxu0 %v876_v48 }
  0x30   :  { %801 = vmatprep.subr.bf16.mxu0 %v877_v49 }
  0x33   :  { %802 = vmatpush3.bf16.msra.mxu0 %v878_v50 }
  0x34   :  { %10 = vsyncpa [#allocation3], 0  ;;  %803 = vmatprep.subr.bf16.mxu0 %v879_v51  ;;  %v881_v58 = vld [vmem:[%s1146_s1 + $0x170] sm:$0xff]   ;;  %551 = vmatprep.mubr.bf16.mxu0 %v34_v54  ;;  %v883_v60 = vld [vmem:[%s1146_s1 + $0x178] sm:$0xff]   ;;  %vm624_vm2 = vcmask 1041408   ;;  %vm620_vm3 = vcmask 162816  }
  0x35   :  { %826 = vmatprep.subr.bf16.mxu1 %v918_v44  ;;  %823 = vmatmul.mubr.msk.bf16.vlgmr.msra.gmra.mrb[4].mxu1 %vm435_vm1, %v35_v57  ;;  %v882_v59 = vld [vmem:[%s1146_s1 + $0x130] sm:$0xff]   ;;  %v884_v61 = vld [vmem:[%s1146_s1 + $0x138] sm:$0xff]   ;;  %v26_v62 = vld [vmem:[%s1145_s0 + $0x20] sm:$0xff]  ;;  %s920_s9 = smov [#allocation2]   ;;  %vm678_vm4 = vcmask 80896  }
  0x36   :  { %830 = vmatprep.mubr.msk.bf16.mxu1 %vm919_vm0, %v918_v44  ;;  %v33_v63 = vpack.c.bf16 %v26_v62, %v26_v62  ;;  %v886_v0 = vld [vmem:[%s1148_s3] sm:$0xff]   ;;  %v887_v1 = vld [vmem:[%s1148_s3 + $0x8] ss:$0 sps:$4 sm:$0x33]   ;;  %s686_s10 = sshll.u32 %s920_s9, 4  ;;  %s687_s10 = int_to_ptr.vmem [resolvable:$true] %s686_s10 }
  0x37   :  { %804 = vmatpush3.bf16.msra.mxu0 %v880_v56  ;;  %827 = vmatpush3.bf16.msra.mxu1 %v886_v0  ;;  %v626_v2 = vsel %vm624_vm2, %v887_v1, 0  ;;  %v694_v4 = vld [vmem:[%s1147_s2] ss:$0 sm:$0xff]  ;;  %p899_p1 = scmp.lt.s32.totalorder %s687_s10, %s687_s10 }
  0x38   :  { %805 = vmatprep.subr.bf16.mxu0 %v881_v58  ;;  %828 = vmatprep.subr.bf16.mxu1 %v918_v44  ;;  %v745_v29 = vld [vmem:[%s1149_s4] ss:$0 sm:$0xff]  ;;  %s894_s4 = scalar_lea.vmem %s687_s10, 128 }
  0x39   :  { %p895_p0 = scmp.ne.s32.totalorder %s687_s10, %s894_s4  ;;  %p900_p2 = scmp.lt.s32.totalorder %s894_s4, %s894_s4 }
  0x3b   :  { %806 = vmatpush3.bf16.msra.mxu0 %v882_v59  ;;  %829 = vmatpush3.bf16.msra.mxu1 %v626_v2  ;;  %p901_p3 = por %p900_p2, %p899_p1 }
  0x3c   :  { %807 = vmatprep.subr.bf16.mxu0 %v883_v60 }
  0x3d   :  { %p902_p4 = pnand %p901_p3, %p895_p0 }
  0x3f   :  { %808 = vmatpush3.bf16.msra.mxu0 %v884_v61 }
  0x42   :  { %552 = vmatmul.mubr.bf16.vlgmr.msra.gmra.mrb[4].mxu0 %v33_v63 }
  0xf5   :  { %v765_v3 = vpop.f32.mrb[0].mxu0 }
  0xf6   :  { %v766_v5 = vpop.f32.mrb[1].mxu0 }
  0xf7   :  { %v767_v6 = vadd.f32 %v766_v5, %v765_v3  ;;  %v768_v7 = vpop.f32.mrb[2].mxu0  ;;  %v787_v8 = vpop.f32.mrb[0].mxu1 }
  0xf8   :  { %v769_v9 = vpop.f32.mrb[3].mxu0  ;;  %v788_v11 = vpop.f32.mrb[1].mxu1 }
  0xf9   :  { %v474_v10 = vadd.f32 %v767_v6, %v694_v4  ;;  %v789_v12 = vadd.f32 %v788_v11, %v787_v8  ;;  %v790_v13 = vpop.f32.mrb[2].mxu1 }
  0xfa   :  { %v791_v14 = vpop.f32.mrb[3].mxu1 }
  0xfb   :  { %v514_v15 = vadd.f32 %v789_v12, %v474_v10 }
 0x108   :  { %v593_v16 = vpop.f32.mrb[4].mxu1 }
 0x109   :  { %v824_v17 = vpop.f32.mrb[5].mxu1 }
 0x10a   :  { %v596_v18 = vpop.f32.mrb[6].mxu1 }
 0x10b   :  { %v825_v19 = vpop.f32.mrb[7].mxu1 }
 0x115   :  { %v809_v20 = vpop.f32.mrb[4].mxu0 }
 0x116   :  { %v810_v21 = vpop.f32.mrb[5].mxu0 }
 0x117   :  { %v811_v22 = vadd.f32 %v810_v21, %v809_v20  ;;  %v812_v23 = vpop.f32.mrb[6].mxu0 }
 0x118   :  { %v813_v24 = vpop.f32.mrb[7].mxu0 }
 0x119   :  { %v554_v25 = vadd.f32 %v811_v22, %v514_v15 }
 0x11b   :  { %v594_v26 = vadd.f32 %v593_v16, %v554_v25 }
 0x11d   :  { %888 = vtanh.f32 %v594_v26 }
 0x127   :  { %v889_v27 = vpop.eup %888 }
 0x128   :  { %v600_v28 = vpack.c.bf16 %v889_v27, %v889_v27 }
 0x12a   :  { %831 = vmatmul.mubr.msk.bf16.vlgmr.msra.gmra.mrb[8].mxu1 %vm620_vm3, %v600_v28 }
 0x1fd   :  { %v662_v30 = vpop.f32.mrb[8].mxu1 }
 0x1fe   :  { %v663_v31 = vadd.f32 %v745_v29, %v662_v30  ;;  %v832_v32 = vpop.f32.mrb[9].mxu1 }
 0x1ff   :  { %v665_v33 = vpop.f32.mrb[10].mxu1 }
 0x200   :  { %668 = vmax.xlane.f32.xlu0 %v663_v31  ;;  %v833_v34 = vpop.f32.mrb[11].mxu1 }
 0x28d   :  { %v669_v35 = vpop.xlane.xlu0 %668 }
 0x28e   :  { %v670_v36 = vsub.f32 %v663_v31, %v669_v35 }
 0x290   :  { %v671_v37 = vmul.f32 1.442695, %v670_v36 }
 0x292   :  { %890 = vpow2.f32 %v671_v37 }
 0x29c   :  { %v891_v38 = vpop.eup %890 }
 0x29d   :  { %673 = vadd.xlane.f32.xlu0 %v891_v38 }
 0x32a   :  { %v674_v39 = vpop.xlane.xlu0 %673 }
 0x32b   :  { %892 = vlog2.f32 %v674_v39 }
 0x335   :  { %v893_v40 = vpop.eup %892 }
 0x336   :  { %v676_v41 = vmul.f32 0.6931472, %v893_v40 }
 0x338   :  { %v677_v42 = vsub.f32 %v670_v36, %v676_v41 }
 0x33a   :  { %679 = vst.msk [vmem:[#allocation2] sm:$0xff] %vm678_vm4, %v677_v42 }
 0x33b   :  { %905 = shalt.err (!%p902_p4)
}
 0x33c   :  { %s906_s13 = scalar_lea.hbm %s1150_s5, 128 }
 0x33d   :  { %p907_p5 = scmp.ne.s32.totalorder %s1150_s5, %s906_s13  ;;  %p910_p6 = scmp.lt.u32.totalorder %s906_s13, %s1150_s5 }
 0x33f   :  { %p912_p7 = pnand %p910_p6, %p907_p5 }
 0x341   :  { %915 = shalt.err (!%p912_p7)
}
 0x342   :  { %689 = dma.vmem_to_hbm [thread:$0]  %s687_s10, 128, %s1150_s5, [#allocation3]  }
 0x343   :  { %916 = dma.done.wait [#allocation3], 128  }
 0x344   :  { %917 = vsyncadd [#allocation3], 4294967168 }
 0x345   :  { %693 = vsyncpa [#allocation3], 1 }

</bundles_post_ra>
